<compile_context>
chip_gen: v7x
topology: tpu7x:2x2x1
jax: 0.10.0
libtpu: 0.0.40
codegen_flags: <defaults>
</compile_context>

<pallas_src>
import functools
import math

import jax
import jax.numpy as jnp
from jax.experimental import pallas as pl
from jax.experimental.pallas import tpu as pltpu

_SUBLANE = 8
_LANES = 128
_SPLIT_MIN_ROWS = 128  # split the grid >=2-ways (megacore) above this many rows


def _round_up(x: int, m: int) -> int:
    return ((x + m - 1) // m) * m


def _rmsnorm_kernel(x_ref, w_ref, o_ref, *, eps: float):
    # x_ref: (block_rows, dim), w_ref: (1, dim) in x.dtype, o_ref: (block_rows, dim)
    xf = x_ref[...].astype(jnp.float32)                           # x.float()
    ms = jnp.mean(xf * xf, axis=-1, keepdims=True)                # pow(2).mean(-1, keepdim=True)
    normed = (xf * jax.lax.rsqrt(ms + eps)).astype(o_ref.dtype)   # _norm(...).type_as(x)
    o_ref[...] = normed * w_ref[...]                              # * weight (broadcast, x.dtype)


def _rmsnorm_packed_kernel(x_ref, w_ref, seg_ref, o_ref, *, eps: float):
    # Lane-dense path for dim < 128: each 128-lane row holds k = 128/dim
    # original rows.  seg_ref is a (128,128) block-diagonal matrix with 1/dim
    # inside each dim-wide segment, so `sq @ seg` is the per-segment mean of
    # x^2 broadcast back across its segment.  The MXU is idle in this
    # memory-bound kernel; HIGHEST precision keeps full f32 accuracy.
    xf = x_ref[...].astype(jnp.float32)
    ms = jnp.dot(xf * xf, seg_ref[...],
                 preferred_element_type=jnp.float32,
                 precision=jax.lax.Precision.HIGHEST)
    normed = (xf * jax.lax.rsqrt(ms + eps)).astype(o_ref.dtype)
    o_ref[...] = normed * w_ref[...]


def _pick_tiling(n_rows: int, last_dim: int, itemsize: int):
    """Pick a row-tile size + VMEM limit from the chip's VMEM capacity."""
    try:
        vmem_cap = pltpu.get_tpu_info().vmem_capacity_bytes   # 128 MiB v5e/v6e, 64 MiB v7x
    except Exception:
        vmem_cap = 64 * 1024 * 1024                            # conservative (v7x) fallback
    vmem_limit = (vmem_cap * 3) // 4                           # headroom for compiler scratch
    # Per-row footprint: double-buffered input + output tiles in x.dtype,
    # the pre-store tile in x.dtype, plus ~3 f32 temporaries (upcast, squared,
    # normed) that Mosaic materializes — conservative so bigger tiles don't OOM
    # on v7x's smaller VMEM.  (The 2x factors ARE the double-buffering; the
    # budget is no longer halved a second time.)
    per_row_bytes = last_dim * (2 * itemsize + 2 * itemsize + itemsize + 3 * 4)
    block_rows = vmem_limit // max(per_row_bytes, 1)
    block_rows = max(_SUBLANE, (block_rows // _SUBLANE) * _SUBLANE)

    # Megacore (v7x has 2 TensorCores): never collapse the grid to one step
    # when there is real work; cap at ~half the rows so both cores get a tile.
    if n_rows >= _SPLIT_MIN_ROWS:
        half = _round_up(pl.cdiv(n_rows, 2), _SUBLANE)
        block_rows = min(block_rows, half)

    if block_rows >= n_rows:
        return n_rows, int(vmem_limit)        # single full-extent block

    # Prefer an even number of grid steps (load balance across 2 TCs).
    grid_len = pl.cdiv(n_rows, block_rows)
    if grid_len > 1 and grid_len % 2 == 1:
        block_rows = _round_up(pl.cdiv(n_rows, grid_len + 1), _SUBLANE)
    return block_rows, int(vmem_limit)


def rmsnorm(x: jax.Array, weight: jax.Array, eps: float, *, block_rows: int | None = None):
    """Applies RMSNorm over the last axis of x with learned scale `weight`.

    `block_rows`, if given, is the row-tile size of the 2-D (possibly
    lane-packed) view handed to the kernel.
    """
    orig_shape = x.shape
    dim = orig_shape[-1]
    assert weight.shape == (dim,)
    rows = math.prod(orig_shape[:-1]) if len(orig_shape) > 1 else 1
    x2 = x.reshape(rows, dim)

    repack = (dim < _LANES) and (_LANES % dim == 0)
    if repack:
        # Pack k rows per 128-lane row so stores are lane-dense (unmasked vst).
        k = _LANES // dim
        rows_p = _round_up(rows, k)
        if rows_p != rows:
            x2 = jnp.pad(x2, ((0, rows_p - rows), (0, 0)))   # rare ragged case: one extra copy
        packed_rows = rows_p // k
        packed_dim = k * dim                                  # == 128
        x2 = x2.reshape(packed_rows, packed_dim)
        w2 = jnp.tile(weight, (k,)).reshape(1, packed_dim).astype(x.dtype)
        seg_ids = jnp.arange(packed_dim, dtype=jnp.int32) // dim
        seg = (seg_ids[:, None] == seg_ids[None, :]).astype(jnp.float32) / float(dim)
        n_rows, last_dim = packed_rows, packed_dim
    else:
        w2 = weight.reshape(1, dim).astype(x.dtype)
        n_rows, last_dim = rows, dim

    auto_block_rows, vmem_limit = _pick_tiling(n_rows, last_dim, x.dtype.itemsize)
    if block_rows is None:
        block_rows = auto_block_rows
    block_rows = min(block_rows, n_rows)

    grid = (pl.cdiv(n_rows, block_rows),)
    compiler_params = pltpu.CompilerParams(
        dimension_semantics=("parallel",),   # shard row-tiles across v7x's 2 TCs
        vmem_limit_bytes=vmem_limit,
    )

    if repack:
        out = pl.pallas_call(
            functools.partial(_rmsnorm_packed_kernel, eps=eps),
            out_shape=jax.ShapeDtypeStruct((n_rows, last_dim), x.dtype),
            grid_spec=pltpu.PrefetchScalarGridSpec(
                num_scalar_prefetch=0,
                grid=grid,
                in_specs=[
                    pl.BlockSpec((block_rows, last_dim), lambda i: (i, 0)),
                    pl.BlockSpec((1, last_dim), lambda i: (0, 0)),
                    pl.BlockSpec((last_dim, last_dim), lambda i: (0, 0)),
                ],
                out_specs=pl.BlockSpec((block_rows, last_dim), lambda i: (i, 0)),
            ),
            compiler_params=compiler_params,
        )(x2, w2, seg)
        out = out.reshape(rows_p, dim)[:rows]
    else:
        out = pl.pallas_call(
            functools.partial(_rmsnorm_kernel, eps=eps),
            out_shape=jax.ShapeDtypeStruct((n_rows, last_dim), x.dtype),
            grid_spec=pltpu.PrefetchScalarGridSpec(
                num_scalar_prefetch=0,
                grid=grid,
                in_specs=[
                    pl.BlockSpec((block_rows, last_dim), lambda i: (i, 0)),
                    pl.BlockSpec((1, last_dim), lambda i: (0, 0)),
                ],
                out_specs=pl.BlockSpec((block_rows, last_dim), lambda i: (i, 0)),
            ),
            compiler_params=compiler_params,
        )(x2, w2)

    return out.reshape(orig_shape)


if __name__ == "__main__":
    eps = 1e-5

    def ref_rmsnorm(x, w):
        xf = x.astype(jnp.float32)
        normed = (xf * jax.lax.rsqrt(jnp.mean(xf * xf, axis=-1, keepdims=True) + eps)
                  ).astype(x.dtype)
        return normed * w.astype(x.dtype)

    key = jax.random.PRNGKey(0)
    k1, k2, k3, k4, kw = jax.random.split(key, 5)

    # Case 1: module-sized input (batch=2, seq=8, dim=32), default weight=ones,
    # auto tiling -> lane-dense packed path (k=4), single-block grid.
    dim = 32
    x1 = jax.random.normal(k1, (2, 8, dim), dtype=jnp.float32)
    w_ones = jnp.ones((dim,), dtype=jnp.float32)
    y1 = jax.block_until_ready(rmsnorm(x1, w_ones, eps))
    assert jnp.allclose(y1, ref_rmsnorm(x1, w_ones), atol=1e-5, rtol=1e-5), "mismatch (case 1)"

    # Case 2: packed path with multi-step grid + ragged final block
    # (rows=100 -> 25 packed rows, block_rows=8 -> grid=4, last block masked).
    w_rand = 1.0 + 0.1 * jax.random.normal(kw, (dim,), dtype=jnp.float32)
    x2 = jax.random.normal(k2, (4, 25, dim), dtype=jnp.float32)
    y2 = jax.block_until_ready(rmsnorm(x2, w_rand, eps, block_rows=8))
    assert jnp.allclose(y2, ref_rmsnorm(x2, w_rand), atol=1e-5, rtol=1e-5), "mismatch (case 2)"

    # Case 3: packed path where rows (21) is not a multiple of k (4) -> row padding.
    x3 = jax.random.normal(k3, (3, 7, dim), dtype=jnp.float32)
    y3 = jax.block_until_ready(rmsnorm(x3, w_rand, eps))
    assert jnp.allclose(y3, ref_rmsnorm(x3, w_rand), atol=1e-5, rtol=1e-5), "mismatch (case 3)"

    # Case 4: plain (unpacked) path with dim >= 128, f32 and bf16.
    dim4 = 256
    w4 = jnp.ones((dim4,), dtype=jnp.float32)
    x4 = jax.random.normal(k4, (2, 8, dim4), dtype=jnp.float32)
    y4 = jax.block_until_ready(rmsnorm(x4, w4, eps))
    assert jnp.allclose(y4, ref_rmsnorm(x4, w4), atol=1e-5, rtol=1e-5), "mismatch (case 4 f32)"

    x5 = x4.astype(jnp.bfloat16)
    y5 = jax.block_until_ready(rmsnorm(x5, w4, eps))
    assert jnp.allclose(y5.astype(jnp.float32), ref_rmsnorm(x5, w4).astype(jnp.float32),
                        atol=2e-2, rtol=2e-2), "mismatch (case 4 bf16)"

    print("KERNEL_OK")
</pallas_src>

<mosaic_0001>
module attributes {stable_mosaic.version = 11 : i64} {
  func.func @_rmsnorm_packed_kernel(%arg0: i32, %arg1: memref<4x128xf32, #tpu.memory_space<vmem>>, %arg2: memref<1x128xf32, #tpu.memory_space<vmem>>, %arg3: memref<128x128xf32, #tpu.memory_space<vmem>>, %arg4: memref<4x128xf32, #tpu.memory_space<vmem>>) attributes {dimension_semantics = [#tpu.dimension_semantics<parallel>], iteration_bounds = array<i64: 1>, scalar_prefetch = 0 : i64, scratch_operands = 0 : i64, tpu.core_type = #tpu.core_type<tc>, window_params = [{transform_indices = @transform_0, window_bounds = array<i64: 4, 128>}, {pipeline_mode = #tpu.pipeline_mode<synchronous>, transform_indices = @transform_1, window_bounds = array<i64: 1, 128>}, {pipeline_mode = #tpu.pipeline_mode<synchronous>, transform_indices = @transform_2, window_bounds = array<i64: 128, 128>}, {transform_indices = @transform_3, window_bounds = array<i64: 4, 128>}]} {
    %c0 = arith.constant 0 : index
    %c0_0 = arith.constant 0 : index
    %0 = vector.load %arg1[%c0, %c0_0] : memref<4x128xf32, #tpu.memory_space<vmem>>, vector<4x128xf32>
    %1 = arith.mulf %0, %0 : vector<4x128xf32>
    %c0_1 = arith.constant 0 : index
    %c0_2 = arith.constant 0 : index
    %2 = vector.load %arg3[%c0_1, %c0_2] : memref<128x128xf32, #tpu.memory_space<vmem>>, vector<128x128xf32>
    %cst = arith.constant dense<0.000000e+00> : vector<4x128xf32>
    %3 = tpu.matmul %1, %2, %cst {dimension_numbers = #tpu.dot_dimension_numbers<[1], [0], [0], [1], [0, 0, 1, 1], [], []>, precision = #tpu.contract_precision<fp32>} : vector<4x128xf32>, vector<128x128xf32>, vector<4x128xf32> -> vector<4x128xf32>
    %cst_3 = arith.constant 9.99999974E-6 : f32
    %4 = vector.broadcast %cst_3 : f32 to vector<4x128xf32>
    %5 = arith.addf %3, %4 : vector<4x128xf32>
    %6 = math.rsqrt %5 : vector<4x128xf32>
    %7 = arith.mulf %0, %6 : vector<4x128xf32>
    %c0_4 = arith.constant 0 : index
    %c0_5 = arith.constant 0 : index
    %8 = vector.load %arg2[%c0_4, %c0_5] : memref<1x128xf32, #tpu.memory_space<vmem>>, vector<1x128xf32>
    %9 = vector.broadcast %8 : vector<1x128xf32> to vector<4x128xf32>
    %10 = arith.mulf %7, %9 : vector<4x128xf32>
    %c0_6 = arith.constant 0 : index
    %c0_7 = arith.constant 0 : index
    %11 = vector.load %arg4[%c0_6, %c0_7] : memref<4x128xf32, #tpu.memory_space<vmem>>, vector<4x128xf32>
    tpu.vector_store %arg4[%c0_6, %c0_7], %10 {strides = array<i32>} : memref<4x128xf32, #tpu.memory_space<vmem>>, vector<4x128xf32>,
    return
  }
  func.func @transform_0(%arg0: i32) -> (i32, i32) {
    %c0_i32 = arith.constant 0 : i32
    %c0_i32_0 = arith.constant 0 : i32
    return %arg0, %c0_i32 : i32, i32
  }
  func.func @transform_1(%arg0: i32) -> (i32, i32) {
    %c0_i32 = arith.constant 0 : i32
    %c0_i32_0 = arith.constant 0 : i32
    %c0_i32_1 = arith.constant 0 : i32
    return %c0_i32, %c0_i32_0 : i32, i32
  }
  func.func @transform_2(%arg0: i32) -> (i32, i32) {
    %c0_i32 = arith.constant 0 : i32
    %c0_i32_0 = arith.constant 0 : i32
    %c0_i32_1 = arith.constant 0 : i32
    return %c0_i32, %c0_i32_0 : i32, i32
  }
  func.func @transform_3(%arg0: i32) -> (i32, i32) {
    %c0_i32 = arith.constant 0 : i32
    %c0_i32_0 = arith.constant 0 : i32
    return %arg0, %c0_i32 : i32, i32
  }
}

</mosaic_0001>

<bundles_post_ra>
// kernel: tpu_custom_call.1
= control target key start
LH: loop header
LB: loop body
LE: loop exit
PB: predicated region body
PF: predicated region fallthrough
CT: control target
= control target key end

     0   :  { %8 = vsyncpa [#allocation3], 0  ;;  %s1602_s0 = inlined_call_operand.hbm [shape: f32[4,128], index: 0, kind: input, shape index: {}]   ;;  %s1603_s1 = inlined_call_operand.vmem [shape: f32[1,128], index: 1, kind: input, shape index: {}]   ;;  %s1604_s2 = inlined_call_operand.hbm [shape: f32[128,128], index: 2, kind: input, shape index: {}]   ;;  %s1605_s3 = inlined_call_operand.hbm [shape: f32[4,128], index: 3, kind: output, shape index: {}]  }
   0x1   :  { %9 = vsyncpa [#allocation6], 0 }
   0x2   :  { %10 = vsyncpa [#allocation4], 0  ;;  %s1276_s12 = smov [#allocation2]   ;;  %s1277_s14 = smov [#allocation5]  }
   0x3   :  { %s17_s13 = sshll.u32 %s1276_s12, 4  ;;  %s28_s15 = sshll.u32 %s1277_s14, 4  ;;  %s18_s13 = int_to_ptr.vmem [resolvable:$true] %s17_s13  ;;  %s1304_s15 = int_to_ptr.vmem [resolvable:$true] %s28_s15 }
   0x4   :  { %s1204_s18 = scalar_lea.hbm %s1602_s0, 64 }
   0x5   :  { %p1205_p0 = scmp.ne.s32.totalorder %s1602_s0, %s1204_s18  ;;  %p1208_p1 = scmp.lt.u32.totalorder %s1204_s18, %s1602_s0 }
   0x7   :  { %p1210_p2 = pnand %p1208_p1, %p1205_p0 }
   0x9   :  { %1213 = shalt.err (!%p1210_p2)
}
   0xa   :  { %s1214_s23 = scalar_lea.vmem %s18_s13, 64  ;;  %p1219_p4 = scmp.lt.s32.totalorder %s18_s13, %s18_s13 }
   0xb   :  { %p1215_p3 = scmp.ne.s32.totalorder %s18_s13, %s1214_s23  ;;  %p1220_p5 = scmp.lt.s32.totalorder %s1214_s23, %s1214_s23 }
   0xd   :  { %p1221_p6 = por %p1220_p5, %p1219_p4 }
   0xf   :  { %p1222_p7 = pnand %p1221_p6, %p1215_p3 }
  0x11   :  { %1225 = shalt.err (!%p1222_p7)
}
  0x12   :  { %20 = dma.hbm_to_vmem [thread:$0]  %s1602_s0, 64, %s18_s13, [#allocation3]  }
  0x13   :  { %s1226_s28 = scalar_lea.hbm %s1604_s2, 2048 }
  0x14   :  { %p1227_p8 = scmp.ne.s32.totalorder %s1604_s2, %s1226_s28  ;;  %p1230_p9 = scmp.lt.u32.totalorder %s1226_s28, %s1604_s2 }
  0x16   :  { %p1232_p10 = pnand %p1230_p9, %p1227_p8 }
  0x18   :  { %1235 = shalt.err (!%p1232_p10)
}
  0x19   :  { %s1236_s6 = scalar_lea.vmem %s1304_s15, 2048  ;;  %p1241_p12 = scmp.lt.s32.totalorder %s1304_s15, %s1304_s15 }
  0x1a   :  { %p1237_p11 = scmp.ne.s32.totalorder %s1304_s15, %s1236_s6  ;;  %p1242_p13 = scmp.lt.s32.totalorder %s1236_s6, %s1236_s6 }
  0x1c   :  { %p1243_p0 = por %p1242_p13, %p1241_p12 }
  0x1e   :  { %p1244_p1 = pnand %p1243_p0, %p1237_p11 }
  0x20   :  { %1247 = shalt.err (!%p1244_p1)
}
  0x21   :  { %s1278_s0 = smov 128   ;;  %s1279_s7 = smov 8  }
  0x22   :  { %34 = dma.hbm_to_vmem [thread:$0]  %s1604_s2, 2048, %s1304_s15, [#allocation6], %s1278_s0, %s1278_s0, %s1279_s7  }
  0x23   :  { %1270 = dma.done.wait [#allocation3], 64  }
  0x24   :  { %1271 = vsyncadd [#allocation3], 4294967232 }
  0x25   :  { %1272 = dma.done.wait [#allocation6], 2048  }
  0x26   :  { %1273 = vsyncadd [#allocation6], 4294965248  ;;  %v1280_v0 = vmov 0.0|0.0   ;;  %vm1281_vm0 = vmmov 0   ;;  %v1282_v1 = vmov 0.0   ;;  %v43_v2 = vld [vmem:[#allocation5] sm:$0xff] }
  0x27   :  { %1040 = vmatprep.subr.bf16.mxu1 %v1280_v0  ;;  %1112 = vmatprep.subr.bf16.mxu0 %v1280_v0  ;;  %v44_v3 = vld [vmem:[#allocation5 + $0x8] sm:$0xff]  ;;  %v45_v4 = vld [vmem:[#allocation5 + $0x10] sm:$0xff]  ;;  %v60_v5 = vand.u32 4294901760, %v43_v2  ;;  %v46_v7 = vld [vmem:[#allocation5 + $0x18] sm:$0xff]  ;;  %s1283_s11 = smov [#allocation7]  }
  0x28   :  { %862 = vmatprep.mubr.msk.f32.mxu1 %vm1281_vm0, %v1282_v1  ;;  %967 = vmatprep.mubr.msk.f32.mxu0 %vm1281_vm0, %v1282_v1  ;;  %v63_v6 = vand.u32 4294901760, %v44_v3  ;;  %v66_v8 = vand.u32 4294901760, %v45_v4  ;;  %v69_v9 = vand.u32 4294901760, %v46_v7  ;;  %v47_v10 = vld [vmem:[#allocation5 + $0x20] sm:$0xff]  ;;  %v48_v11 = vld [vmem:[#allocation5 + $0x28] sm:$0xff]  ;;  %v49_v16 = vld [vmem:[#allocation5 + $0x30] sm:$0xff] }
  0x29   :  { %v72_v14 = vand.u32 4294901760, %v47_v10  ;;  %v75_v15 = vand.u32 4294901760, %v48_v11  ;;  %v50_v17 = vld [vmem:[#allocation5 + $0x38] sm:$0xff]  ;;  %v78_v19 = vand.u32 4294901760, %v49_v16  ;;  %v1357_v22 = vld [vmem:[#allocation5 + $0x40] sm:$0xff]  ;;  %v1359_v23 = vld [vmem:[#allocation5 + $0x48] sm:$0xff]  ;;  %v1375_v30 = vsub.f32 %v43_v2, %v60_v5 }
  0x2a   :  { %v1341_v12 = vpack.c.bf16 %v63_v6, %v60_v5  ;;  %v1345_v13 = vpack.c.bf16 %v69_v9, %v66_v8  ;;  %v81_v20 = vand.u32 4294901760, %v50_v17  ;;  %v1353_v21 = vld [vmem:[#allocation2] sm:$0xf]  ;;  %v84_v26 = vand.u32 4294901760, %v1357_v22  ;;  %v1371_v28 = vld [vmem:[#allocation5 + $0x50] sm:$0xff]  ;;  %v1387_v36 = vld [vmem:[#allocation5 + $0x60] sm:$0xff] }
  0x2b   :  { %v1351_v18 = vpack.c.bf16 %v75_v15, %v72_v14  ;;  %v42_v24 = vmul.f32 %v1353_v21, %v1353_v21  ;;  %v87_v27 = vand.u32 4294901760, %v1359_v23  ;;  %v1373_v29 = vld [vmem:[#allocation5 + $0x58] sm:$0xff]  ;;  %v1379_v32 = vsub.f32 %v44_v3, %v63_v6  ;;  %v1391_v37 = vld [vmem:[#allocation5 + $0x68] sm:$0xff]  ;;  %v1410_v44 = vld [vmem:[#allocation5 + $0x70] sm:$0xff]  ;;  %s717_s12 = sshll.u32 %s1283_s11, 4  ;;  %s718_s12 = int_to_ptr.vmem [resolvable:$true] %s717_s12 }
  0x2c   :  { %1042 = vmatpush3.bf16.msra.mxu1 %v1341_v12  ;;  %1114 = vmatpush3.bf16.msra.mxu0 %v1341_v12  ;;  %v1365_v25 = vpack.c.bf16 %v81_v20, %v78_v19  ;;  %v90_v34 = vand.u32 4294901760, %v1371_v28  ;;  %v93_v35 = vand.u32 4294901760, %v1373_v29  ;;  %v1393_v38 = vsub.f32 %v45_v4, %v66_v8  ;;  %v1412_v45 = vld [vmem:[#allocation5 + $0x78] sm:$0xff]  ;;  %s1248_s13 = scalar_lea.vmem %s718_s12, 64  ;;  %p1253_p3 = scmp.lt.s32.totalorder %s718_s12, %s718_s12 }
  0x2d   :  { %1043 = vmatprep.subr.bf16.mxu1 %v1280_v0  ;;  %1115 = vmatprep.subr.bf16.mxu0 %v1280_v0  ;;  %v1377_v31 = vand.u32 4294901760, %v42_v24  ;;  %v1383_v33 = vpack.c.bf16 %v87_v27, %v84_v26  ;;  %v1395_v39 = vsub.f32 %v46_v7, %v69_v9  ;;  %v96_v40 = vand.u32 4294901760, %v1387_v36  ;;  %p1249_p2 = scmp.ne.s32.totalorder %s718_s12, %s1248_s13  ;;  %p1254_p4 = scmp.lt.s32.totalorder %s1248_s13, %s1248_s13 }
  0x2e   :  { %v1407_v42 = vpack.c.bf16 %v93_v35, %v90_v34  ;;  %v99_v43 = vand.u32 4294901760, %v1391_v37  ;;  %v153_v46 = vand.u32 4294901760, %v1375_v30  ;;  %v160_v47 = vand.u32 4294901760, %v1379_v32 }
  0x2f   :  { %v1399_v41 = vsub.f32 %v42_v24, %v1377_v31  ;;  %v1418_v48 = vsub.f32 %v47_v10, %v72_v14  ;;  %v1420_v49 = vsub.f32 %v48_v11, %v75_v15  ;;  %v102_v50 = vand.u32 4294901760, %v1410_v44  ;;  %p1255_p5 = por %p1254_p4, %p1253_p3 }
  0x30   :  { %1045 = vmatpush3.bf16.msra.mxu1 %v1345_v13  ;;  %1117 = vmatpush3.bf16.msra.mxu0 %v1345_v13  ;;  %v105_v51 = vand.u32 4294901760, %v1412_v45  ;;  %v167_v53 = vand.u32 4294901760, %v1393_v38  ;;  %v1432_v54 = vpack.c.bf16 %v99_v43, %v96_v40  ;;  %v154_v55 = vsub.f32 %v1375_v30, %v153_v46 }
  0x31   :  { %1046 = vmatprep.subr.bf16.mxu1 %v1280_v0  ;;  %1118 = vmatprep.subr.bf16.mxu0 %v1280_v0  ;;  %v142_v52 = vand.u32 4294901760, %v1399_v41  ;;  %v161_v56 = vsub.f32 %v1379_v32, %v160_v47  ;;  %v174_v57 = vand.u32 4294901760, %v1395_v39  ;;  %v1439_v58 = vsub.f32 %v49_v16, %v78_v19  ;;  %p1256_p6 = pnand %p1255_p5, %p1249_p2 }
  0x32   :  { %v1441_v59 = vsub.f32 %v50_v17, %v81_v20  ;;  %v168_v61 = vsub.f32 %v1393_v38, %v167_v53  ;;  %v181_v62 = vand.u32 4294901760, %v1418_v48  ;;  %v188_v63 = vand.u32 4294901760, %v1420_v49 }
  0x33   :  { %v143_v60 = vsub.f32 %v1399_v41, %v142_v52  ;;  %v1453_v2 = vpack.c.bf16 %v105_v51, %v102_v50  ;;  %v155_v3 = vand.u32 4294901760, %v154_v55  ;;  %v162_v4 = vand.u32 4294901760, %v161_v56 }
  0x34   :  { %1048 = vmatpush3.bf16.msra.mxu1 %v1351_v18  ;;  %1120 = vmatpush3.bf16.msra.mxu0 %v1351_v18  ;;  %v175_v5 = vsub.f32 %v1395_v39, %v174_v57  ;;  %v1459_v6 = vsub.f32 %v1357_v22, %v84_v26  ;;  %v1462_v7 = vsub.f32 %v1359_v23, %v87_v27  ;;  %v169_v10 = vand.u32 4294901760, %v168_v61 }
  0x35   :  { %1049 = vmatprep.subr.bf16.mxu1 %v1280_v0  ;;  %1121 = vmatprep.subr.bf16.mxu0 %v1280_v0  ;;  %v1137_v8 = vpack.c.bf16 %v160_v47, %v153_v46  ;;  %v144_v9 = vand.u32 4294901760, %v143_v60  ;;  %v182_v11 = vsub.f32 %v1418_v48, %v181_v62  ;;  %v189_v14 = vsub.f32 %v1420_v49, %v188_v63 }
  0x36   :  { %v1065_v15 = vpack.c.bf16 %v162_v4, %v155_v3  ;;  %v176_v16 = vand.u32 4294901760, %v175_v5  ;;  %v195_v17 = vand.u32 4294901760, %v1439_v58  ;;  %v202_v19 = vand.u32 4294901760, %v1441_v59 }
  0x37   :  { %v1475_v20 = vsub.f32 %v1371_v28, %v90_v34  ;;  %v1480_v22 = vsub.f32 %v1373_v29, %v93_v35  ;;  %v1140_v23 = vpack.c.bf16 %v174_v57, %v167_v53  ;;  %v183_v24 = vand.u32 4294901760, %v182_v11 }
  0x38   :  { %1051 = vmatpush3.bf16.msra.mxu1 %v1365_v25  ;;  %1123 = vmatpush3.bf16.msra.mxu0 %v1365_v25  ;;  %v190_v26 = vand.u32 4294901760, %v189_v14  ;;  %v209_v27 = vand.u32 4294901760, %v1459_v6  ;;  %v1068_v46 = vpack.c.bf16 %v176_v16, %v169_v10  ;;  %v196_v47 = vsub.f32 %v1439_v58, %v195_v17 }
  0x39   :  { %1052 = vmatprep.subr.bf16.mxu1 %v1280_v0  ;;  %1124 = vmatprep.subr.bf16.mxu0 %v1280_v0  ;;  %v203_v28 = vsub.f32 %v1441_v59, %v202_v19  ;;  %v216_v34 = vand.u32 4294901760, %v1462_v7  ;;  %v1491_v29 = vsub.f32 %v1387_v36, %v96_v40  ;;  %v1496_v35 = vsub.f32 %v1391_v37, %v99_v43 }
  0x3a   :  { %v1143_v53 = vpack.c.bf16 %v188_v63, %v181_v62  ;;  %v210_v55 = vsub.f32 %v1459_v6, %v209_v27  ;;  %v223_v56 = vand.u32 4294901760, %v1475_v20  ;;  %v197_v36 = vand.u32 4294901760, %v196_v47 }
  0x3b   :  { %v204_v40 = vand.u32 4294901760, %v203_v28  ;;  %v217_v57 = vsub.f32 %v1462_v7, %v216_v34  ;;  %v230_v37 = vand.u32 4294901760, %v1480_v22  ;;  %v1511_v43 = vsub.f32 %v1410_v44, %v102_v50 }
  0x3c   :  { %1054 = vmatpush3.bf16.msra.mxu1 %v1383_v33  ;;  %1126 = vmatpush3.bf16.msra.mxu0 %v1383_v33  ;;  %v1516_v60 = vsub.f32 %v1412_v45, %v105_v51  ;;  %v1146_v61 = vpack.c.bf16 %v202_v19, %v195_v17  ;;  %v211_v62 = vand.u32 4294901760, %v210_v55  ;;  %v224_v63 = vsub.f32 %v1475_v20, %v223_v56 }
  0x3d   :  { %1055 = vmatprep.subr.bf16.mxu1 %v1280_v0  ;;  %1127 = vmatprep.subr.bf16.mxu0 %v1280_v0  ;;  %v237_v3 = vand.u32 4294901760, %v1491_v29  ;;  %v1074_v4 = vpack.c.bf16 %v204_v40, %v197_v36  ;;  %v218_v5 = vand.u32 4294901760, %v217_v57  ;;  %v244_v44 = vand.u32 4294901760, %v1496_v35 }
  0x3e   :  { %v1149_v45 = vpack.c.bf16 %v216_v34, %v209_v27  ;;  %v225_v50 = vand.u32 4294901760, %v224_v63  ;;  %v1152_v16 = vpack.c.bf16 %v230_v37, %v223_v56  ;;  %v1092_v55 = vpack.c.bf16 %v1395_v39, %v1393_v38 }
  0x3f   :  { %v238_v51 = vsub.f32 %v1491_v29, %v237_v3  ;;  %v1077_v10 = vpack.c.bf16 %v218_v5, %v211_v62  ;;  %v245_v14 = vsub.f32 %v1496_v35, %v244_v44 }
  0x40   :  { %1057 = vmatpush3.bf16.msra.mxu1 %v1407_v42  ;;  %1129 = vmatpush3.bf16.msra.mxu0 %v1407_v42 }
  0x41   :  { %1058 = vmatprep.subr.bf16.mxu1 %v1280_v0  ;;  %1130 = vmatprep.subr.bf16.mxu0 %v1280_v0  ;;  %v239_v17 = vand.u32 4294901760, %v238_v51 }
  0x44   :  { %1060 = vmatpush3.bf16.msra.mxu1 %v1432_v54  ;;  %1132 = vmatpush3.bf16.msra.mxu0 %v1432_v54 }
  0x45   :  { %1061 = vmatprep.subr.bf16.mxu1 %v1280_v0  ;;  %1133 = vmatprep.subr.bf16.mxu0 %v1280_v0 }
  0x48   :  { %1063 = vmatpush3.bf16.msra.mxu1 %v1453_v2  ;;  %1135 = vmatpush3.bf16.msra.mxu0 %v1453_v2 }
  0x49   :  { %1064 = vmatprep.subr.bf16.mxu1 %v1280_v0  ;;  %1136 = vmatprep.subr.bf16.mxu0 %v1280_v0 }
  0x4b   :  { %863 = vmatmul.mubr.f32.vlgmr.msra.gmra.mrb[0].mxu1 %v144_v9  ;;  %968 = vmatmul.mubr.f32.vlgmr.msra.gmra.mrb[0].mxu0 %v142_v52  ;;  %v1071_v52 = vpack.c.bf16 %v190_v26, %v183_v24  ;;  %v251_v9 = vand.u32 4294901760, %v1511_v43 }
  0x4c   :  { %1066 = vmatpush3.bf16.msra.mxu1 %v1065_v15  ;;  %1138 = vmatpush3.bf16.msra.mxu0 %v1137_v8  ;;  %v231_v8 = vsub.f32 %v1480_v22, %v230_v37  ;;  %v258_v15 = vand.u32 4294901760, %v1516_v60 }
  0x4d   :  { %1067 = vmatprep.subr.bf16.mxu1 %v1280_v0  ;;  %1139 = vmatprep.subr.bf16.mxu0 %v1280_v0  ;;  %v252_v24 = vsub.f32 %v1511_v43, %v251_v9 }
  0x4e   :  { %897 = vmatprep.mubr.msk.f32.mxu1 %vm1281_vm0, %v1282_v1  ;;  %1002 = vmatprep.mubr.msk.f32.mxu0 %vm1281_vm0, %v1282_v1  ;;  %v232_v11 = vand.u32 4294901760, %v231_v8  ;;  %v259_v26 = vsub.f32 %v1516_v60, %v258_v15 }
  0x4f   :  { %v253_v47 = vand.u32 4294901760, %v252_v24 }
  0x50   :  { %1069 = vmatpush3.bf16.msra.mxu1 %v1068_v46  ;;  %1141 = vmatpush3.bf16.msra.mxu0 %v1140_v23  ;;  %v1080_v19 = vpack.c.bf16 %v232_v11, %v225_v50  ;;  %v246_v23 = vand.u32 4294901760, %v245_v14  ;;  %v1155_v46 = vpack.c.bf16 %v244_v44, %v237_v3  ;;  %v260_v28 = vand.u32 4294901760, %v259_v26 }
  0x51   :  { %1070 = vmatprep.subr.bf16.mxu1 %v1280_v0  ;;  %1142 = vmatprep.subr.bf16.mxu0 %v1280_v0 }
  0x52   :  { %v1083_v27 = vpack.c.bf16 %v246_v23, %v239_v17  ;;  %v1086_v34 = vpack.c.bf16 %v260_v28, %v253_v47 }
  0x54   :  { %1072 = vmatpush3.bf16.msra.mxu1 %v1071_v52  ;;  %1144 = vmatpush3.bf16.msra.mxu0 %v1143_v53  ;;  %v1158_v52 = vpack.c.bf16 %v258_v15, %v251_v9  ;;  %v1089_v53 = vpack.c.bf16 %v1379_v32, %v1375_v30  ;;  %v1095_v30 = vpack.c.bf16 %v1420_v49, %v1418_v48 }
  0x55   :  { %1073 = vmatprep.subr.bf16.mxu1 %v1280_v0  ;;  %1145 = vmatprep.subr.bf16.mxu0 %v1280_v0 }
  0x58   :  { %1075 = vmatpush3.bf16.msra.mxu1 %v1074_v4  ;;  %1147 = vmatpush3.bf16.msra.mxu0 %v1146_v61 }
  0x59   :  { %1076 = vmatprep.subr.bf16.mxu1 %v1280_v0  ;;  %1148 = vmatprep.subr.bf16.mxu0 %v1280_v0 }
  0x5c   :  { %1078 = vmatpush3.bf16.msra.mxu1 %v1077_v10  ;;  %1150 = vmatpush3.bf16.msra.mxu0 %v1149_v45 }
  0x5d   :  { %1079 = vmatprep.subr.bf16.mxu1 %v1280_v0  ;;  %1151 = vmatprep.subr.bf16.mxu0 %v1280_v0 }
  0x60   :  { %1081 = vmatpush3.bf16.msra.mxu1 %v1080_v19  ;;  %1153 = vmatpush3.bf16.msra.mxu0 %v1152_v16 }
  0x61   :  { %1082 = vmatprep.subr.bf16.mxu1 %v1280_v0  ;;  %1154 = vmatprep.subr.bf16.mxu0 %v1280_v0 }
  0x64   :  { %1084 = vmatpush3.bf16.msra.mxu1 %v1083_v27  ;;  %1156 = vmatpush3.bf16.msra.mxu0 %v1155_v46 }
  0x65   :  { %1085 = vmatprep.subr.bf16.mxu1 %v1280_v0  ;;  %1157 = vmatprep.subr.bf16.mxu0 %v1280_v0 }
  0x68   :  { %1087 = vmatpush3.bf16.msra.mxu1 %v1086_v34  ;;  %1159 = vmatpush3.bf16.msra.mxu0 %v1158_v52 }
  0x69   :  { %1088 = vmatprep.subr.bf16.mxu1 %v1280_v0  ;;  %1160 = vmatprep.subr.bf16.mxu0 %v1280_v0 }
  0x6b   :  { %898 = vmatmul.mubr.f32.vlgmr.msra.gmra.mrb[0].mxu1 %v1377_v31  ;;  %1003 = vmatmul.mubr.f32.vlgmr.msra.gmra.mrb[0].mxu0 %v1377_v31 }
  0x6c   :  { %1090 = vmatpush3.bf16.msra.mxu1 %v1089_v53  ;;  %1162 = vmatpush3.bf16.msra.mxu0 %v1341_v12  ;;  %v1098_v12 = vpack.c.bf16 %v1441_v59, %v1439_v58 }
  0x6d   :  { %1091 = vmatprep.subr.bf16.mxu1 %v1280_v0  ;;  %1163 = vmatprep.subr.bf16.mxu0 %v1280_v0 }
  0x6e   :  { %932 = vmatprep.mubr.msk.f32.mxu1 %vm1281_vm0, %v1282_v1  ;;  %1037 = vmatprep.mubr.msk.f32.mxu0 %vm1281_vm0, %v1282_v1  ;;  %v1101_v1 = vpack.c.bf16 %v1462_v7, %v1459_v6 }
  0x70   :  { %1093 = vmatpush3.bf16.msra.mxu1 %v1092_v55  ;;  %1165 = vmatpush3.bf16.msra.mxu0 %v1345_v13  ;;  %v1104_v13 = vpack.c.bf16 %v1480_v22, %v1475_v20 }
  0x71   :  { %1094 = vmatprep.subr.bf16.mxu1 %v1280_v0  ;;  %1166 = vmatprep.subr.bf16.mxu0 %v1280_v0 }
  0x74   :  { %1096 = vmatpush3.bf16.msra.mxu1 %v1095_v30  ;;  %1168 = vmatpush3.bf16.msra.mxu0 %v1351_v18  ;;  %v1107_v18 = vpack.c.bf16 %v1496_v35, %v1491_v29 }
  0x75   :  { %1097 = vmatprep.subr.bf16.mxu1 %v1280_v0  ;;  %1169 = vmatprep.subr.bf16.mxu0 %v1280_v0 }
  0x78   :  { %1099 = vmatpush3.bf16.msra.mxu1 %v1098_v12  ;;  %1171 = vmatpush3.bf16.msra.mxu0 %v1365_v25  ;;  %v1110_v25 = vpack.c.bf16 %v1516_v60, %v1511_v43 }
  0x79   :  { %1100 = vmatprep.subr.bf16.mxu1 %v1280_v0  ;;  %1172 = vmatprep.subr.bf16.mxu0 %v1280_v0 }
  0x7c   :  { %1102 = vmatpush3.bf16.msra.mxu1 %v1101_v1  ;;  %1174 = vmatpush3.bf16.msra.mxu0 %v1383_v33 }
  0x7d   :  { %1103 = vmatprep.subr.bf16.mxu1 %v1280_v0  ;;  %1175 = vmatprep.subr.bf16.mxu0 %v1280_v0 }
  0x80   :  { %1105 = vmatpush3.bf16.msra.mxu1 %v1104_v13  ;;  %1177 = vmatpush3.bf16.msra.mxu0 %v1407_v42 }
  0x81   :  { %1106 = vmatprep.subr.bf16.mxu1 %v1280_v0  ;;  %1178 = vmatprep.subr.bf16.mxu0 %v1280_v0 }
  0x84   :  { %1108 = vmatpush3.bf16.msra.mxu1 %v1107_v18  ;;  %1180 = vmatpush3.bf16.msra.mxu0 %v1432_v54  ;;  %v727_v54 = vld [vmem:[%s1603_s1] ss:$0 sm:$0xff] }
  0x85   :  { %1109 = vmatprep.subr.bf16.mxu1 %v1280_v0  ;;  %1181 = vmatprep.subr.bf16.mxu0 %v1280_v0 }
  0x88   :  { %1111 = vmatpush3.bf16.msra.mxu1 %v1110_v25  ;;  %1183 = vmatpush3.bf16.msra.mxu0 %v1453_v2 }
  0x8b   :  { %933 = vmatmul.mubr.f32.vlgmr.msra.gmra.mrb[0].mxu1 %v1399_v41  ;;  %1038 = vmatmul.mubr.f32.vlgmr.msra.gmra.mrb[0].mxu0 %v1377_v31 }
 0x15e   :  { %v401_v32 = vpop.f32.mrb[0].mxu1  ;;  %v696_v33 = vpop.f32.mrb[0].mxu0 }
 0x15f   :  { %v1184_v38 = vadd.f32 1e-05, %v401_v32  ;;  %v934_v39 = vpop.f32.mrb[1].mxu1  ;;  %v1039_v42 = vpop.f32.mrb[1].mxu0 }
 0x161   :  { %v1185_v48 = vadd.f32 %v1184_v38, %v696_v33 }
 0x163   :  { %1202 = vrsqrt.f32 %v1185_v48 }
 0x16d   :  { %v1203_v49 = vpop.eup %1202 }
 0x16e   :  { %v701_v0 = vmul.f32 %v1203_v49, %v1353_v21 }
 0x170   :  { %v709_v58 = vmul.f32 %v727_v54, %v701_v0 }
 0x172   :  { %710 = vst [vmem:[#allocation7] sm:$0xf] %v709_v58 }
 0x173   :  { %1259 = shalt.err (!%p1256_p6)
}
 0x174   :  { %s1260_s16 = scalar_lea.hbm %s1605_s3, 64 }
 0x175   :  { %p1261_p7 = scmp.ne.s32.totalorder %s1605_s3, %s1260_s16  ;;  %p1264_p8 = scmp.lt.u32.totalorder %s1260_s16, %s1605_s3 }
 0x177   :  { %p1266_p9 = pnand %p1264_p8, %p1261_p7 }
 0x179   :  { %1269 = shalt.err (!%p1266_p9)
}
 0x17a   :  { %720 = dma.vmem_to_hbm [thread:$0]  %s718_s12, 64, %s1605_s3, [#allocation4]  }
 0x17b   :  { %1274 = dma.done.wait [#allocation4], 64  }
 0x17c   :  { %1275 = vsyncadd [#allocation4], 4294967232 }
 0x17d   :  { %724 = vsyncpa [#allocation3], 1 }
 0x17e   :  { %725 = vsyncpa [#allocation6], 1 }
 0x17f   :  { %726 = vsyncpa [#allocation4], 1 }

</bundles_post_ra>
